<compile_context>
chip_gen: v6e
topology: v6e:2x2x1
jax: 0.10.0
libtpu: 0.0.40
codegen_flags: <defaults>
</compile_context>

<pallas_src>
import jax
import jax.numpy as jnp
from jax.experimental import pallas as pl
from jax.experimental.pallas import tpu as pltpu


def _predict_kernel(x_ref, w1_ref, b1_ref, w2_ref, b2_ref, o_ref):
    # x tile arrives already in the MXU compute dtype (bf16 or f32); accumulate in f32.
    h = jnp.dot(x_ref[...], w1_ref[...], preferred_element_type=jnp.float32) + b1_ref[...]
    h = jnp.tanh(h)                                             # f32, EUP slot
    # dropout: identity (inference mode)
    out = jnp.dot(h.astype(w2_ref.dtype), w2_ref[...],
                  preferred_element_type=jnp.float32) + b2_ref[...]
    o_ref[...] = out.astype(o_ref.dtype)


def _round_up(n, m):
    return ((n + m - 1) // m) * m


def global_predictor(x, gamma, beta, w1, b1, w2, b2, *,
                     eps=1e-5, use_bf16=True, tile_b=2048, single_buffer_weights=True):
    """Forward pass of GlobalPredictor.

    x: (B, d_model); gamma/beta: (1, d_model); w1: (d_model, d_h); b1: (1, d_h);
    w2: (d_h, d_out); b2: (1, d_out).  Returns (B, d_out) f32.
    """
    B, d_model = x.shape
    d_h = w1.shape[1]
    d_out = w2.shape[1]

    compute_dtype = jnp.bfloat16 if use_bf16 else jnp.float32
    x_k = x.astype(compute_dtype)          # streamed input in MXU-native dtype (wrapper-side cast)

    # ---- BatchNorm1d folded into fc1 (full-batch, training-mode statistics). ----
    if B != 1:  # static shape -> trace-time branch, same semantics as the PyTorch guard
        xs = x_k.astype(jnp.float32)
        mean = jnp.mean(xs, axis=0, keepdims=True)                               # (1, d_model)
        var = jnp.mean(jnp.square(xs - mean), axis=0, keepdims=True)             # two-pass, biased
        scale = gamma.astype(jnp.float32) * jax.lax.rsqrt(var + eps)             # (1, d_model)
        shift = beta.astype(jnp.float32) - mean * scale                          # (1, d_model)
        w1_eff = w1.astype(jnp.float32) * scale.T                                # (d_model, d_h)
        b1_eff = b1.astype(jnp.float32) + shift @ w1.astype(jnp.float32)         # (1, d_h)
    else:
        # B == 1: BatchNorm is skipped; gamma/beta never touch the kernel.
        w1_eff = w1.astype(jnp.float32)
        b1_eff = b1.astype(jnp.float32)
    w2_eff = w2.astype(jnp.float32)
    b2_eff = b2.astype(jnp.float32)

    # ---- Lane-dense hidden dim: pad d_h up to a multiple of 128 (zero pad -> exact result). ----
    d_h_pad = _round_up(d_h, 128)
    if d_h_pad != d_h:
        w1_eff = jnp.pad(w1_eff, ((0, 0), (0, d_h_pad - d_h)))
        b1_eff = jnp.pad(b1_eff, ((0, 0), (0, d_h_pad - d_h)))
        w2_eff = jnp.pad(w2_eff, ((0, d_h_pad - d_h), (0, 0)))

    w1_k = w1_eff.astype(compute_dtype)    # MXU operands (resident in VMEM)
    w2_k = w2_eff.astype(compute_dtype)
    b1_k = b1_eff                          # biases stay f32 (added to f32 accumulators)
    b2_k = b2_eff

    # ---- Batch tiling: stream x/out over B, keep weights resident. ----
    sub = 16 if use_bf16 else 8            # sublane multiple for the streamed x dtype
    tile_b = max(sub, _round_up(int(tile_b), sub))
    if B <= sub:
        tb = B                             # single block == full array dim -> always legal
    else:
        # Split into >= 2 grid steps so v7x's two TensorCores both get work (no-op on v5e/v6e).
        half = _round_up(pl.cdiv(B, 2), sub)
        tb = min(tile_b, half) if half < B else B
    grid = (pl.cdiv(B, tb),)

    # ---- VMEM budget (block footprint; conservative 2 buffers for weights). ----
    x_bytes = jnp.dtype(compute_dtype).itemsize
    w_bytes = x_bytes

    def _vmem_estimate(tb_):
        return (2 * tb_ * d_model * x_bytes                                   # x double-buffer
                + 2 * tb_ * d_out * 4                                         # out double-buffer
                + 2 * ((d_model * d_h_pad + d_h_pad * d_out) * w_bytes
                       + (d_h_pad + d_out) * 4)                               # resident weights
                + tb_ * d_h_pad * (4 + w_bytes))                              # h f32 + recast copy

    try:
        cap = int(pltpu.get_tpu_info().vmem_capacity_bytes) * 3 // 4          # ~48 MiB on v7x
    except Exception:
        cap = 48 << 20
    while _vmem_estimate(tb) > cap and tb > sub:
        tb = max(sub, _round_up(tb // 2, sub))
        grid = (pl.cdiv(B, tb),)
    vmem_limit = int(min(max(int(_vmem_estimate(tb) * 1.25), 4 << 20), cap))

    def _run(single_buffer):
        w_kwargs = {"pipeline_mode": pl.Buffered(1)} if single_buffer else {}
        call = pl.pallas_call(
            _predict_kernel,
            out_shape=jax.ShapeDtypeStruct((B, d_out), jnp.float32),
            grid=grid,
            in_specs=[
                pl.BlockSpec((tb, d_model), lambda i: (i, 0)),                    # x: batch-tiled
                pl.BlockSpec((d_model, d_h_pad), lambda i: (0, 0), **w_kwargs),   # w1 (BN-folded)
                pl.BlockSpec((1, d_h_pad), lambda i: (0, 0), **w_kwargs),         # b1 (BN-folded)
                pl.BlockSpec((d_h_pad, d_out), lambda i: (0, 0), **w_kwargs),     # w2
                pl.BlockSpec((1, d_out), lambda i: (0, 0), **w_kwargs),           # b2
            ],
            out_specs=pl.BlockSpec((tb, d_out), lambda i: (i, 0)),                # unpadded output
            compiler_params=pltpu.CompilerParams(
                dimension_semantics=("parallel",),                                # v7x: 2 TCs
                vmem_limit_bytes=vmem_limit,
            ),
        )
        return call(x_k, w1_k, b1_k, w2_k, b2_k)

    if single_buffer_weights:
        try:
            return jax.block_until_ready(_run(True))
        except Exception:
            # pipeline_mode=pl.Buffered(1) unsupported on this jax/libtpu -> default buffering.
            pass
    return _run(False)


def _reference(x, gamma, beta, w1, b1, w2, b2):
    if x.shape[0] != 1:
        mean = jnp.mean(x, axis=0, keepdims=True)
        var = jnp.mean((x - mean) ** 2, axis=0, keepdims=True)
        x = (x - mean) / jnp.sqrt(var + 1e-5)
        x = x * gamma + beta
    h = jnp.tanh(x @ w1 + b1)
    return h @ w2 + b2


if __name__ == "__main__":
    # Small, self-consistent shapes.
    B, d_model, d_h, d_out = 8, 32, 64, 16

    key = jax.random.PRNGKey(0)
    kx, kg, kb, kw1, kb1, kw2, kb2 = jax.random.split(key, 7)

    x = jax.random.normal(kx, (B, d_model), dtype=jnp.float32)

    # Deterministic synthetic parameters mirroring the module's parameter shapes.
    gamma = 1.0 + 0.1 * jax.random.normal(kg, (1, d_model), dtype=jnp.float32)   # BN weight
    beta = 0.1 * jax.random.normal(kb, (1, d_model), dtype=jnp.float32)          # BN bias
    w1 = jax.random.normal(kw1, (d_model, d_h), dtype=jnp.float32) * (1.0 / jnp.sqrt(d_model))
    b1 = 0.01 * jax.random.normal(kb1, (1, d_h), dtype=jnp.float32)
    w2 = jax.random.normal(kw2, (d_h, d_out), dtype=jnp.float32) * (1.0 / jnp.sqrt(d_h))
    b2 = 0.01 * jax.random.normal(kb2, (1, d_out), dtype=jnp.float32)

    ref = _reference(x, gamma, beta, w1, b1, w2, b2)

    # f32 MXU path: tight check of kernel structure / BN fold / d_h padding / unpadded output.
    out_f32 = jax.block_until_ready(
        global_predictor(x, gamma, beta, w1, b1, w2, b2, use_bf16=False))
    assert out_f32.shape == (B, d_out)
    assert jnp.allclose(out_f32, ref, atol=1e-4, rtol=1e-4), "f32 kernel mismatch vs reference"

    # bf16 MXU path (production config): loosened tolerance for bf16 operand rounding.
    out_bf16 = jax.block_until_ready(
        global_predictor(x, gamma, beta, w1, b1, w2, b2, use_bf16=True))
    assert out_bf16.shape == (B, d_out)
    assert jnp.allclose(out_bf16, ref, atol=5e-2, rtol=5e-2), "bf16 kernel mismatch vs reference"

    # B == 1 path (BatchNorm skipped, matching the PyTorch guard).
    x1 = x[:1]
    out_b1 = jax.block_until_ready(
        global_predictor(x1, gamma, beta, w1, b1, w2, b2, use_bf16=False))
    ref_b1 = _reference(x1, gamma, beta, w1, b1, w2, b2)
    assert jnp.allclose(out_b1, ref_b1, atol=1e-4, rtol=1e-4), "B==1 kernel mismatch vs reference"

    print("KERNEL_OK")
</pallas_src>

<mosaic_0001>
module attributes {stable_mosaic.version = 11 : i64} {
  func.func @_predict_kernel(%arg0: i32, %arg1: memref<8x32xf32, #tpu.memory_space<vmem>>, %arg2: memref<32x128xf32, #tpu.memory_space<vmem>>, %arg3: memref<1x128xf32, #tpu.memory_space<vmem>>, %arg4: memref<128x16xf32, #tpu.memory_space<vmem>>, %arg5: memref<1x16xf32, #tpu.memory_space<vmem>>, %arg6: memref<8x16xf32, #tpu.memory_space<vmem>>) attributes {dimension_semantics = [#tpu.dimension_semantics<parallel>], iteration_bounds = array<i64: 1>, scalar_prefetch = 0 : i64, scratch_operands = 0 : i64, tpu.core_type = #tpu.core_type<tc>, window_params = [{transform_indices = @transform_0, window_bounds = array<i64: 8, 32>}, {pipeline_mode = #tpu.pipeline_mode<synchronous>, transform_indices = @transform_1, window_bounds = array<i64: 32, 128>}, {pipeline_mode = #tpu.pipeline_mode<synchronous>, transform_indices = @transform_2, window_bounds = array<i64: 1, 128>}, {pipeline_mode = #tpu.pipeline_mode<synchronous>, transform_indices = @transform_3, window_bounds = array<i64: 128, 16>}, {pipeline_mode = #tpu.pipeline_mode<synchronous>, transform_indices = @transform_4, window_bounds = array<i64: 1, 16>}, {transform_indices = @transform_5, window_bounds = array<i64: 8, 16>}]} {
    %c0 = arith.constant 0 : index
    %c0_0 = arith.constant 0 : index
    %0 = vector.load %arg1[%c0, %c0_0] : memref<8x32xf32, #tpu.memory_space<vmem>>, vector<8x32xf32>
    %c0_1 = arith.constant 0 : index
    %c0_2 = arith.constant 0 : index
    %1 = vector.load %arg2[%c0_1, %c0_2] : memref<32x128xf32, #tpu.memory_space<vmem>>, vector<32x128xf32>
    %cst = arith.constant dense<0.000000e+00> : vector<8x128xf32>
    %2 = tpu.matmul %0, %1, %cst {dimension_numbers = #tpu.dot_dimension_numbers<[1], [0], [0], [1], [0, 0, 1, 1], [], []>} : vector<8x32xf32>, vector<32x128xf32>, vector<8x128xf32> -> vector<8x128xf32>
    %c0_3 = arith.constant 0 : index
    %c0_4 = arith.constant 0 : index
    %3 = vector.load %arg3[%c0_3, %c0_4] : memref<1x128xf32, #tpu.memory_space<vmem>>, vector<1x128xf32>
    %4 = vector.broadcast %3 : vector<1x128xf32> to vector<8x128xf32>
    %5 = arith.addf %2, %4 : vector<8x128xf32>
    %6 = math.tanh %5 : vector<8x128xf32>
    %c0_5 = arith.constant 0 : index
    %c0_6 = arith.constant 0 : index
    %7 = vector.load %arg4[%c0_5, %c0_6] : memref<128x16xf32, #tpu.memory_space<vmem>>, vector<128x16xf32>
    %cst_7 = arith.constant dense<0.000000e+00> : vector<8x16xf32>
    %8 = tpu.matmul %6, %7, %cst_7 {dimension_numbers = #tpu.dot_dimension_numbers<[1], [0], [0], [1], [0, 0, 1, 1], [], []>} : vector<8x128xf32>, vector<128x16xf32>, vector<8x16xf32> -> vector<8x16xf32>
    %c0_8 = arith.constant 0 : index
    %c0_9 = arith.constant 0 : index
    %9 = vector.load %arg5[%c0_8, %c0_9] : memref<1x16xf32, #tpu.memory_space<vmem>>, vector<1x16xf32>
    %10 = vector.broadcast %9 : vector<1x16xf32> to vector<8x16xf32>
    %11 = arith.addf %8, %10 : vector<8x16xf32>
    %c0_10 = arith.constant 0 : index
    %c0_11 = arith.constant 0 : index
    %12 = vector.load %arg6[%c0_10, %c0_11] : memref<8x16xf32, #tpu.memory_space<vmem>>, vector<8x16xf32>
    tpu.vector_store %arg6[%c0_10, %c0_11], %11 {strides = array<i32>} : memref<8x16xf32, #tpu.memory_space<vmem>>, vector<8x16xf32>,
    return
  }
  func.func @transform_0(%arg0: i32) -> (i32, i32) {
    %c0_i32 = arith.constant 0 : i32
    %c0_i32_0 = arith.constant 0 : i32
    return %arg0, %c0_i32 : i32, i32
  }
  func.func @transform_1(%arg0: i32) -> (i32, i32) {
    %c0_i32 = arith.constant 0 : i32
    %c0_i32_0 = arith.constant 0 : i32
    %c0_i32_1 = arith.constant 0 : i32
    return %c0_i32, %c0_i32_0 : i32, i32
  }
  func.func @transform_2(%arg0: i32) -> (i32, i32) {
    %c0_i32 = arith.constant 0 : i32
    %c0_i32_0 = arith.constant 0 : i32
    %c0_i32_1 = arith.constant 0 : i32
    return %c0_i32, %c0_i32_0 : i32, i32
  }
  func.func @transform_3(%arg0: i32) -> (i32, i32) {
    %c0_i32 = arith.constant 0 : i32
    %c0_i32_0 = arith.constant 0 : i32
    %c0_i32_1 = arith.constant 0 : i32
    return %c0_i32, %c0_i32_0 : i32, i32
  }
  func.func @transform_4(%arg0: i32) -> (i32, i32) {
    %c0_i32 = arith.constant 0 : i32
    %c0_i32_0 = arith.constant 0 : i32
    %c0_i32_1 = arith.constant 0 : i32
    return %c0_i32, %c0_i32_0 : i32, i32
  }
  func.func @transform_5(%arg0: i32) -> (i32, i32) {
    %c0_i32 = arith.constant 0 : i32
    %c0_i32_0 = arith.constant 0 : i32
    return %arg0, %c0_i32 : i32, i32
  }
}

module attributes {stable_mosaic.version = 11 : i64} {
  func.func @_predict_kernel(%arg0: i32, %arg1: memref<8x32xf32, #tpu.memory_space<vmem>>, %arg2: memref<32x128xf32, #tpu.memory_space<vmem>>, %arg3: memref<1x128xf32, #tpu.memory_space<vmem>>, %arg4: memref<128x16xf32, #tpu.memory_space<vmem>>, %arg5: memref<1x16xf32, #tpu.memory_space<vmem>>, %arg6: memref<8x16xf32, #tpu.memory_space<vmem>>) attributes {dimension_semantics = [#tpu.dimension_semantics<parallel>], iteration_bounds = array<i64: 1>, scalar_prefetch = 0 : i64, scratch_operands = 0 : i64, tpu.core_type = #tpu.core_type<tc>, window_params = [{transform_indices = @transform_0, window_bounds = array<i64: 8, 32>}, {pipeline_mode = #tpu.pipeline_mode<synchronous>, transform_indices = @transform_1, window_bounds = array<i64: 32, 128>}, {pipeline_mode = #tpu.pipeline_mode<synchronous>, transform_indices = @transform_2, window_bounds = array<i64: 1, 128>}, {pipeline_mode = #tpu.pipeline_mode<synchronous>, transform_indices = @transform_3, window_bounds = array<i64: 128, 16>}, {pipeline_mode = #tpu.pipeline_mode<synchronous>, transform_indices = @transform_4, window_bounds = array<i64: 1, 16>}, {transform_indices = @transform_5, window_bounds = array<i64: 8, 16>}]} {
    %c0 = arith.constant 0 : index
    %c0_0 = arith.constant 0 : index
    %0 = vector.load %arg1[%c0, %c0_0] : memref<8x32xf32, #tpu.memory_space<vmem>>, vector<8x32xf32>
    %c0_1 = arith.constant 0 : index
    %c0_2 = arith.constant 0 : index
    %1 = vector.load %arg2[%c0_1, %c0_2] : memref<32x128xf32, #tpu.memory_space<vmem>>, vector<32x128xf32>
    %cst = arith.constant dense<0.000000e+00> : vector<8x128xf32>
    %2 = tpu.matmul %0, %1, %cst {dimension_numbers = #tpu.dot_dimension_numbers<[1], [0], [0], [1], [0, 0, 1, 1], [], []>} : vector<8x32xf32>, vector<32x128xf32>, vector<8x128xf32> -> vector<8x128xf32>
    %c0_3 = arith.constant 0 : index
    %c0_4 = arith.constant 0 : index
    %3 = vector.load %arg3[%c0_3, %c0_4] : memref<1x128xf32, #tpu.memory_space<vmem>>, vector<1x128xf32>
    %4 = vector.broadcast %3 : vector<1x128xf32> to vector<8x128xf32>
    %5 = arith.addf %2, %4 : vector<8x128xf32>
    %6 = math.tanh %5 : vector<8x128xf32>
    %c0_5 = arith.constant 0 : index
    %c0_6 = arith.constant 0 : index
    %7 = vector.load %arg4[%c0_5, %c0_6] : memref<128x16xf32, #tpu.memory_space<vmem>>, vector<128x16xf32>
    %cst_7 = arith.constant dense<0.000000e+00> : vector<8x16xf32>
    %8 = tpu.matmul %6, %7, %cst_7 {dimension_numbers = #tpu.dot_dimension_numbers<[1], [0], [0], [1], [0, 0, 1, 1], [], []>} : vector<8x128xf32>, vector<128x16xf32>, vector<8x16xf32> -> vector<8x16xf32>
    %c0_8 = arith.constant 0 : index
    %c0_9 = arith.constant 0 : index
    %9 = vector.load %arg5[%c0_8, %c0_9] : memref<1x16xf32, #tpu.memory_space<vmem>>, vector<1x16xf32>
    %10 = vector.broadcast %9 : vector<1x16xf32> to vector<8x16xf32>
    %11 = arith.addf %8, %10 : vector<8x16xf32>
    %c0_10 = arith.constant 0 : index
    %c0_11 = arith.constant 0 : index
    %12 = vector.load %arg6[%c0_10, %c0_11] : memref<8x16xf32, #tpu.memory_space<vmem>>, vector<8x16xf32>
    tpu.vector_store %arg6[%c0_10, %c0_11], %11 {strides = array<i32>} : memref<8x16xf32, #tpu.memory_space<vmem>>, vector<8x16xf32>,
    return
  }
  func.func @transform_0(%arg0: i32) -> (i32, i32) {
    %c0_i32 = arith.constant 0 : i32
    %c0_i32_0 = arith.constant 0 : i32
    return %arg0, %c0_i32 : i32, i32
  }
  func.func @transform_1(%arg0: i32) -> (i32, i32) {
    %c0_i32 = arith.constant 0 : i32
    %c0_i32_0 = arith.constant 0 : i32
    %c0_i32_1 = arith.constant 0 : i32
    return %c0_i32, %c0_i32_0 : i32, i32
  }
  func.func @transform_2(%arg0: i32) -> (i32, i32) {
    %c0_i32 = arith.constant 0 : i32
    %c0_i32_0 = arith.constant 0 : i32
    %c0_i32_1 = arith.constant 0 : i32
    return %c0_i32, %c0_i32_0 : i32, i32
  }
  func.func @transform_3(%arg0: i32) -> (i32, i32) {
    %c0_i32 = arith.constant 0 : i32
    %c0_i32_0 = arith.constant 0 : i32
    %c0_i32_1 = arith.constant 0 : i32
    return %c0_i32, %c0_i32_0 : i32, i32
  }
  func.func @transform_4(%arg0: i32) -> (i32, i32) {
    %c0_i32 = arith.constant 0 : i32
    %c0_i32_0 = arith.constant 0 : i32
    %c0_i32_1 = arith.constant 0 : i32
    return %c0_i32, %c0_i32_0 : i32, i32
  }
  func.func @transform_5(%arg0: i32) -> (i32, i32) {
    %c0_i32 = arith.constant 0 : i32
    %c0_i32_0 = arith.constant 0 : i32
    return %arg0, %c0_i32 : i32, i32
  }
}

</mosaic_0001>

<bundles_post_ra>
// kernel: tpu_custom_call.1
= control target key start
LH: loop header
LB: loop body
LE: loop exit
PB: predicated region body
PF: predicated region fallthrough
CT: control target
= control target key end

     0   :  { %v315_v1 = vmov 0.0   ;;  %vm316_vm0 = vmmov 0   ;;  %s444_s0 = inlined_call_operand.vmem [shape: f32[8,32], index: 0, kind: input, shape index: {}]   ;;  %s445_s1 = inlined_call_operand.vmem [shape: f32[32,128], index: 1, kind: input, shape index: {}]   ;;  %s446_s2 = inlined_call_operand.vmem [shape: f32[1,128], index: 2, kind: input, shape index: {}]   ;;  %s447_s3 = inlined_call_operand.vmem [shape: f32[128,16], index: 3, kind: input, shape index: {}]   ;;  %s448_s4 = inlined_call_operand.vmem [shape: f32[1,16], index: 4, kind: input, shape index: {}]   ;;  %s449_s5 = inlined_call_operand.hbm [shape: f32[8,16], index: 5, kind: output, shape index: {}]  }
   0x1   :  { %v25_v0 = vld [vmem:[%s445_s1 + $0x18] sm:$0xff]  ;;  %242 = vmatprep.subr.mxu0 %v315_v1  ;;  %v24_v2 = vld [vmem:[%s445_s1 + $0x10] sm:$0xff]  ;;  %250 = vmatprep.mubr.msk.f32.mxu0 %vm316_vm0, %v315_v1  ;;  %v23_v5 = vld [vmem:[%s445_s1 + $0x8] sm:$0xff] }
   0x2   :  { %v123_v3 = vld [vmem:[%s447_s3 + $0x78] sm:$0xff]  ;;  %243 = vmatpush3.msra.mxu0 %v25_v0  ;;  %253 = vmatprep.subr.mxu1 %v315_v1  ;;  %v122_v4 = vld [vmem:[%s447_s3 + $0x70] sm:$0xff]  ;;  %v121_v6 = vld [vmem:[%s447_s3 + $0x68] sm:$0xff] }
   0x3   :  { %244 = vmatprep.subr.mxu0 %v315_v1  ;;  %254 = vmatpush3.msra.mxu1 %v123_v3 }
   0x4   :  { %245 = vmatpush3.msra.mxu0 %v24_v2  ;;  %255 = vmatprep.subr.mxu1 %v315_v1 }
   0x5   :  { %10 = vsyncpa [#allocation3], 0  ;;  %246 = vmatprep.subr.mxu0 %v315_v1  ;;  %v22_v7 = vld [vmem:[%s445_s1] sm:$0xff]  ;;  %256 = vmatpush3.msra.mxu1 %v122_v4  ;;  %vm33_vm1 = vcmask 261120   ;;  %v119_v10 = vld [vmem:[%s447_s3 + $0x58] sm:$0xff]  ;;  %s317_s11 = smov [#allocation2]  }
   0x6   :  { %247 = vmatpush3.msra.mxu0 %v23_v5  ;;  %v21_v8 = vld [vmem:[%s444_s0] sm:$0xff]  ;;  %257 = vmatprep.subr.mxu1 %v315_v1  ;;  %v118_v11 = vld [vmem:[%s447_s3 + $0x50] sm:$0xff]  ;;  %v117_v12 = vld [vmem:[%s447_s3 + $0x48] sm:$0xff]  ;;  %vm201_vm2 = vcmask 130048  }
   0x7   :  { %v120_v9 = vld [vmem:[%s447_s3 + $0x60] sm:$0xff]  ;;  %248 = vmatprep.subr.mxu0 %v315_v1  ;;  %258 = vmatpush3.msra.mxu1 %v121_v6  ;;  %v115_v14 = vld [vmem:[%s447_s3 + $0x38] sm:$0xff]  ;;  %v114_v15 = vld [vmem:[%s447_s3 + $0x30] sm:$0xff] }
   0x8   :  { %249 = vmatpush3.msra.mxu0 %v22_v7  ;;  %259 = vmatprep.subr.mxu1 %v315_v1  ;;  %v116_v13 = vld [vmem:[%s447_s3 + $0x40] sm:$0xff]  ;;  %v113_v16 = vld [vmem:[%s447_s3 + $0x28] sm:$0xff]  ;;  %v111_v18 = vld [vmem:[%s447_s3 + $0x18] sm:$0xff] }
   0x9   :  { %251 = vmatmul.mubr.msk.f32.vlgmr.msra.gmra.mxu0 %vm33_vm1, %v21_v8  ;;  %260 = vmatpush3.msra.mxu1 %v120_v9  ;;  %v112_v17 = vld [vmem:[%s447_s3 + $0x20] sm:$0xff]  ;;  %v110_v19 = vld [vmem:[%s447_s3 + $0x10] sm:$0xff]  ;;  %v109_v20 = vld [vmem:[%s447_s3 + $0x8] sm:$0xff] }
   0xa   :  { %261 = vmatprep.subr.mxu1 %v315_v1  ;;  %285 = vmatprep.mubr.msk.f32.mxu1 %vm316_vm0, %v315_v1  ;;  %v108_v21 = vld [vmem:[%s447_s3] sm:$0xff]  ;;  %s209_s3 = sshll.u32 %s317_s11, 4  ;;  %s210_s3 = int_to_ptr.vmem [resolvable:$true] %s209_s3 }
   0xb   :  { %262 = vmatpush3.msra.mxu1 %v119_v10  ;;  %v217_v22 = vld [vmem:[%s446_s2] ss:$0 sm:$0xff]  ;;  %s293_s0 = scalar_lea.vmem %s210_s3, 128  ;;  %p298_p1 = scmp.lt.s32.totalorder %s210_s3, %s210_s3 }
   0xc   :  { %263 = vmatprep.subr.mxu1 %v315_v1  ;;  %v219_v27 = vld [vmem:[%s448_s4] ss:$0 sm:$0xff]  ;;  %p294_p0 = scmp.ne.s32.totalorder %s210_s3, %s293_s0  ;;  %p299_p2 = scmp.lt.s32.totalorder %s293_s0, %s293_s0 }
   0xd   :  { %264 = vmatpush3.msra.mxu1 %v118_v11 }
   0xe   :  { %265 = vmatprep.subr.mxu1 %v315_v1  ;;  %p300_p3 = por %p299_p2, %p298_p1 }
   0xf   :  { %266 = vmatpush3.msra.mxu1 %v117_v12 }
  0x10   :  { %267 = vmatprep.subr.mxu1 %v315_v1  ;;  %p301_p4 = pnand %p300_p3, %p294_p0 }
  0x11   :  { %268 = vmatpush3.msra.mxu1 %v116_v13 }
  0x12   :  { %269 = vmatprep.subr.mxu1 %v315_v1 }
  0x13   :  { %270 = vmatpush3.msra.mxu1 %v115_v14 }
  0x14   :  { %271 = vmatprep.subr.mxu1 %v315_v1 }
  0x15   :  { %272 = vmatpush3.msra.mxu1 %v114_v15 }
  0x16   :  { %273 = vmatprep.subr.mxu1 %v315_v1 }
  0x17   :  { %274 = vmatpush3.msra.mxu1 %v113_v16 }
  0x18   :  { %275 = vmatprep.subr.mxu1 %v315_v1 }
  0x19   :  { %276 = vmatpush3.msra.mxu1 %v112_v17 }
  0x1a   :  { %277 = vmatprep.subr.mxu1 %v315_v1 }
  0x1b   :  { %278 = vmatpush3.msra.mxu1 %v111_v18 }
  0x1c   :  { %279 = vmatprep.subr.mxu1 %v315_v1 }
  0x1d   :  { %280 = vmatpush3.msra.mxu1 %v110_v19 }
  0x1e   :  { %281 = vmatprep.subr.mxu1 %v315_v1 }
  0x1f   :  { %282 = vmatpush3.msra.mxu1 %v109_v20 }
  0x20   :  { %283 = vmatprep.subr.mxu1 %v315_v1 }
  0x21   :  { %284 = vmatpush3.msra.mxu1 %v108_v21 }
  0xc9   :  { %v103_v23 = vpop.f32.mrf.mxu0 }
  0xca   :  { %v104_v24 = vadd.f32 %v217_v22, %v103_v23 }
  0xcb   :  { %v252_v25 = vpop.f32.mrf.mxu0 }
  0xcc   :  { %291 = vtanh.f32 %v104_v24 }
  0xd9   :  { %v292_v26 = vpop.eup %291 }
  0xda   :  { %286 = vmatmul.mubr.f32.vlgmr.msra.gmra.mxu1 %v292_v26 }
 0x19a   :  { %v197_v28 = vpop.f32.mrf.mxu1 }
 0x19b   :  { %v198_v29 = vadd.f32 %v219_v27, %v197_v28 }
 0x19c   :  { %v287_v30 = vpop.f32.mrf.mxu1 }
 0x19d   :  { %202 = vst.msk [vmem:[#allocation2] sm:$0xff] %vm201_vm2, %v198_v29 }
 0x19e   :  { %304 = shalt.err (!%p301_p4)
}
 0x19f   :  { %212 = dma.vmem_to_hbm [thread:$0]  %s210_s3, 128, %s449_s5, [#allocation3]  }
 0x1a0   :  { %313 = dma.done.wait [#allocation3], 128  }
 0x1a1   :  { %314 = vsyncadd [#allocation3], 4294967168 }
 0x1a2   :  { %216 = vsyncpa [#allocation3], 1 }

// kernel: tpu_custom_call.1
= control target key start
LH: loop header
LB: loop body
LE: loop exit
PB: predicated region body
PF: predicated region fallthrough
CT: control target
= control target key end

     0   :  { %v315_v1 = vmov 0.0   ;;  %vm316_vm0 = vmmov 0   ;;  %s444_s0 = inlined_call_operand.vmem [shape: f32[8,32], index: 0, kind: input, shape index: {}]   ;;  %s445_s1 = inlined_call_operand.vmem [shape: f32[32,128], index: 1, kind: input, shape index: {}]   ;;  %s446_s2 = inlined_call_operand.vmem [shape: f32[1,128], index: 2, kind: input, shape index: {}]   ;;  %s447_s3 = inlined_call_operand.vmem [shape: f32[128,16], index: 3, kind: input, shape index: {}]   ;;  %s448_s4 = inlined_call_operand.vmem [shape: f32[1,16], index: 4, kind: input, shape index: {}]   ;;  %s449_s5 = inlined_call_operand.hbm [shape: f32[8,16], index: 5, kind: output, shape index: {}]  }
   0x1   :  { %v25_v0 = vld [vmem:[%s445_s1 + $0x18] sm:$0xff]  ;;  %242 = vmatprep.subr.mxu0 %v315_v1  ;;  %v24_v2 = vld [vmem:[%s445_s1 + $0x10] sm:$0xff]  ;;  %250 = vmatprep.mubr.msk.f32.mxu0 %vm316_vm0, %v315_v1  ;;  %v23_v5 = vld [vmem:[%s445_s1 + $0x8] sm:$0xff] }
   0x2   :  { %v123_v3 = vld [vmem:[%s447_s3 + $0x78] sm:$0xff]  ;;  %243 = vmatpush3.msra.mxu0 %v25_v0  ;;  %253 = vmatprep.subr.mxu1 %v315_v1  ;;  %v122_v4 = vld [vmem:[%s447_s3 + $0x70] sm:$0xff]  ;;  %v121_v6 = vld [vmem:[%s447_s3 + $0x68] sm:$0xff] }
   0x3   :  { %244 = vmatprep.subr.mxu0 %v315_v1  ;;  %254 = vmatpush3.msra.mxu1 %v123_v3 }
   0x4   :  { %245 = vmatpush3.msra.mxu0 %v24_v2  ;;  %255 = vmatprep.subr.mxu1 %v315_v1 }
   0x5   :  { %10 = vsyncpa [#allocation3], 0  ;;  %246 = vmatprep.subr.mxu0 %v315_v1  ;;  %v22_v7 = vld [vmem:[%s445_s1] sm:$0xff]  ;;  %256 = vmatpush3.msra.mxu1 %v122_v4  ;;  %vm33_vm1 = vcmask 261120   ;;  %v119_v10 = vld [vmem:[%s447_s3 + $0x58] sm:$0xff]  ;;  %s317_s11 = smov [#allocation2]  }
   0x6   :  { %247 = vmatpush3.msra.mxu0 %v23_v5  ;;  %v21_v8 = vld [vmem:[%s444_s0] sm:$0xff]  ;;  %257 = vmatprep.subr.mxu1 %v315_v1  ;;  %v118_v11 = vld [vmem:[%s447_s3 + $0x50] sm:$0xff]  ;;  %v117_v12 = vld [vmem:[%s447_s3 + $0x48] sm:$0xff]  ;;  %vm201_vm2 = vcmask 130048  }
   0x7   :  { %v120_v9 = vld [vmem:[%s447_s3 + $0x60] sm:$0xff]  ;;  %248 = vmatprep.subr.mxu0 %v315_v1  ;;  %258 = vmatpush3.msra.mxu1 %v121_v6  ;;  %v115_v14 = vld [vmem:[%s447_s3 + $0x38] sm:$0xff]  ;;  %v114_v15 = vld [vmem:[%s447_s3 + $0x30] sm:$0xff] }
   0x8   :  { %249 = vmatpush3.msra.mxu0 %v22_v7  ;;  %259 = vmatprep.subr.mxu1 %v315_v1  ;;  %v116_v13 = vld [vmem:[%s447_s3 + $0x40] sm:$0xff]  ;;  %v113_v16 = vld [vmem:[%s447_s3 + $0x28] sm:$0xff]  ;;  %v111_v18 = vld [vmem:[%s447_s3 + $0x18] sm:$0xff] }
   0x9   :  { %251 = vmatmul.mubr.msk.f32.vlgmr.msra.gmra.mxu0 %vm33_vm1, %v21_v8  ;;  %260 = vmatpush3.msra.mxu1 %v120_v9  ;;  %v112_v17 = vld [vmem:[%s447_s3 + $0x20] sm:$0xff]  ;;  %v110_v19 = vld [vmem:[%s447_s3 + $0x10] sm:$0xff]  ;;  %v109_v20 = vld [vmem:[%s447_s3 + $0x8] sm:$0xff] }
   0xa   :  { %261 = vmatprep.subr.mxu1 %v315_v1  ;;  %285 = vmatprep.mubr.msk.f32.mxu1 %vm316_vm0, %v315_v1  ;;  %v108_v21 = vld [vmem:[%s447_s3] sm:$0xff]  ;;  %s209_s3 = sshll.u32 %s317_s11, 4  ;;  %s210_s3 = int_to_ptr.vmem [resolvable:$true] %s209_s3 }
   0xb   :  { %262 = vmatpush3.msra.mxu1 %v119_v10  ;;  %v217_v22 = vld [vmem:[%s446_s2] ss:$0 sm:$0xff]  ;;  %s293_s0 = scalar_lea.vmem %s210_s3, 128  ;;  %p298_p1 = scmp.lt.s32.totalorder %s210_s3, %s210_s3 }
   0xc   :  { %263 = vmatprep.subr.mxu1 %v315_v1  ;;  %v219_v27 = vld [vmem:[%s448_s4] ss:$0 sm:$0xff]  ;;  %p294_p0 = scmp.ne.s32.totalorder %s210_s3, %s293_s0  ;;  %p299_p2 = scmp.lt.s32.totalorder %s293_s0, %s293_s0 }
   0xd   :  { %264 = vmatpush3.msra.mxu1 %v118_v11 }
   0xe   :  { %265 = vmatprep.subr.mxu1 %v315_v1  ;;  %p300_p3 = por %p299_p2, %p298_p1 }
   0xf   :  { %266 = vmatpush3.msra.mxu1 %v117_v12 }
  0x10   :  { %267 = vmatprep.subr.mxu1 %v315_v1  ;;  %p301_p4 = pnand %p300_p3, %p294_p0 }
  0x11   :  { %268 = vmatpush3.msra.mxu1 %v116_v13 }
  0x12   :  { %269 = vmatprep.subr.mxu1 %v315_v1 }
  0x13   :  { %270 = vmatpush3.msra.mxu1 %v115_v14 }
  0x14   :  { %271 = vmatprep.subr.mxu1 %v315_v1 }
  0x15   :  { %272 = vmatpush3.msra.mxu1 %v114_v15 }
  0x16   :  { %273 = vmatprep.subr.mxu1 %v315_v1 }
  0x17   :  { %274 = vmatpush3.msra.mxu1 %v113_v16 }
  0x18   :  { %275 = vmatprep.subr.mxu1 %v315_v1 }
  0x19   :  { %276 = vmatpush3.msra.mxu1 %v112_v17 }
  0x1a   :  { %277 = vmatprep.subr.mxu1 %v315_v1 }
  0x1b   :  { %278 = vmatpush3.msra.mxu1 %v111_v18 }
  0x1c   :  { %279 = vmatprep.subr.mxu1 %v315_v1 }
  0x1d   :  { %280 = vmatpush3.msra.mxu1 %v110_v19 }
  0x1e   :  { %281 = vmatprep.subr.mxu1 %v315_v1 }
  0x1f   :  { %282 = vmatpush3.msra.mxu1 %v109_v20 }
  0x20   :  { %283 = vmatprep.subr.mxu1 %v315_v1 }
  0x21   :  { %284 = vmatpush3.msra.mxu1 %v108_v21 }
  0xc9   :  { %v103_v23 = vpop.f32.mrf.mxu0 }
  0xca   :  { %v104_v24 = vadd.f32 %v217_v22, %v103_v23 }
  0xcb   :  { %v252_v25 = vpop.f32.mrf.mxu0 }
  0xcc   :  { %291 = vtanh.f32 %v104_v24 }
  0xd9   :  { %v292_v26 = vpop.eup %291 }
  0xda   :  { %286 = vmatmul.mubr.f32.vlgmr.msra.gmra.mxu1 %v292_v26 }
 0x19a   :  { %v197_v28 = vpop.f32.mrf.mxu1 }
 0x19b   :  { %v198_v29 = vadd.f32 %v219_v27, %v197_v28 }
 0x19c   :  { %v287_v30 = vpop.f32.mrf.mxu1 }
 0x19d   :  { %202 = vst.msk [vmem:[#allocation2] sm:$0xff] %vm201_vm2, %v198_v29 }
 0x19e   :  { %304 = shalt.err (!%p301_p4)
}
 0x19f   :  { %212 = dma.vmem_to_hbm [thread:$0]  %s210_s3, 128, %s449_s5, [#allocation3]  }
 0x1a0   :  { %313 = dma.done.wait [#allocation3], 128  }
 0x1a1   :  { %314 = vsyncadd [#allocation3], 4294967168 }
 0x1a2   :  { %216 = vsyncpa [#allocation3], 1 }

</bundles_post_ra>
